<compile_context>
chip_gen: v7x
topology: tpu7x:2x2x1
jax: 0.10.0
libtpu: 0.0.40
codegen_flags: <defaults>
</compile_context>

<pallas_src>
import functools

import jax
import jax.numpy as jnp
from jax.experimental import pallas as pl
from jax.experimental.pallas import tpu as pltpu


def _leaky_relu_kernel(x_ref, o_ref, *, negative_slope):
    x = x_ref[...]
    # Computed in the input dtype (bf16 stays bf16); VPU select + multiply.
    o_ref[...] = jnp.where(x > 0, x, x * negative_slope)


def _pick_lane(n: int) -> int:
    """Largest lane width (multiple of 128) that divides n, else 1024."""
    for lane in (1024, 512, 256, 128):
        if n % lane == 0:
            return lane
    return 1024


def pallas_leaky_relu(x, negative_slope: float = 0.01, *,
                      min_pallas_bytes: int = 256 * 1024):
    """LeakyReLU via a Pallas TPU kernel (any shape, floating dtypes)."""
    if x.size == 0:
        return x

    if not jnp.issubdtype(x.dtype, jnp.floating):
        # Integer/bool inputs: torch promotes (0.01 * int -> float); the kernel
        # would truncate on store, so use the plain XLA path with promotion.
        return jnp.where(x > 0, x, negative_slope * x)

    n = x.size
    itemsize = jnp.dtype(x.dtype).itemsize

    # Tiny activations: let XLA fuse them; pallas_call launch would dominate.
    if n * itemsize < min_pallas_bytes:
        return jnp.where(x > 0, x, x * negative_slope)

    flat = x.reshape(-1)
    lane = _pick_lane(n)
    n_bulk = (n // lane) * lane          # lane-aligned bulk goes to the kernel
    tail = n - n_bulk                    # < lane elements (only if n % 128 != 0)

    # ~4 MiB input tile -> 16 MiB double-buffered (in+out); multiple of 8 rows.
    row_tile = max(8, ((4 << 20) // (lane * itemsize)) // 8 * 8)

    parts = []
    if n_bulk:
        rows = n_bulk // lane
        rt = min(row_tile, rows)         # either mult-of-8 or == full rows dim
        bulk2d = flat[:n_bulk].reshape(rows, lane)

        bulk_out = pl.pallas_call(
            functools.partial(_leaky_relu_kernel,
                              negative_slope=negative_slope),
            out_shape=jax.ShapeDtypeStruct((rows, lane), x.dtype),
            grid_spec=pltpu.PrefetchScalarGridSpec(
                num_scalar_prefetch=0,
                grid=(pl.cdiv(rows, rt),),   # last block may be partial (masked)
                in_specs=[pl.BlockSpec((rt, lane), lambda i: (i, 0))],
                out_specs=pl.BlockSpec((rt, lane), lambda i: (i, 0)),
            ),
            compiler_params=pltpu.CompilerParams(
                dimension_semantics=("parallel",),   # megacore sharding on v7x
                vmem_limit_bytes=48 << 20,           # headroom for 16 MiB tiles
            ),
        )(bulk2d)
        parts.append(bulk_out.reshape(-1))

    if tail:
        t = flat[n_bulk:]
        parts.append(jnp.where(t > 0, t, t * negative_slope))

    out = parts[0] if len(parts) == 1 else jnp.concatenate(parts)
    return out.reshape(x.shape)


if __name__ == "__main__":
    key0, key1 = jax.random.split(jax.random.PRNGKey(0))

    # Small activation-module input: (batch, channels, H, W).
    x = jax.random.normal(key0, (2, 4, 16, 16), dtype=jnp.float32)

    # Force the Pallas path (default would take the tiny-input XLA fast path).
    out = pallas_leaky_relu(x, negative_slope=0.01, min_pallas_bytes=0)
    out = jax.block_until_ready(out)
    ref = jnp.where(x > 0, x, 0.01 * x)
    assert out.shape == x.shape and out.dtype == x.dtype
    assert jnp.allclose(out, ref, atol=1e-6, rtol=1e-6)

    # Ragged size (not a multiple of 128): exercises kernel bulk + tail path.
    y = jax.random.normal(key1, (3, 5, 7, 11), dtype=jnp.float32)
    out_y = jax.block_until_ready(
        pallas_leaky_relu(y, negative_slope=0.2, min_pallas_bytes=0))
    ref_y = jnp.where(y > 0, y, 0.2 * y)
    assert out_y.shape == y.shape and jnp.allclose(out_y, ref_y, atol=1e-6)

    # Default small-input fast path still matches.
    out_fast = jax.block_until_ready(pallas_leaky_relu(x, negative_slope=0.01))
    assert jnp.allclose(out_fast, ref, atol=1e-6, rtol=1e-6)

    print("KERNEL_OK")
</pallas_src>

<mosaic_0001>
module attributes {stable_mosaic.version = 11 : i64} {
  func.func @_leaky_relu_kernel(%arg0: i32, %arg1: memref<2x1024xf32, #tpu.memory_space<vmem>>, %arg2: memref<2x1024xf32, #tpu.memory_space<vmem>>) attributes {dimension_semantics = [#tpu.dimension_semantics<parallel>], iteration_bounds = array<i64: 1>, scalar_prefetch = 0 : i64, scratch_operands = 0 : i64, tpu.core_type = #tpu.core_type<tc>, window_params = [{transform_indices = @transform_0, window_bounds = array<i64: 2, 1024>}, {transform_indices = @transform_1, window_bounds = array<i64: 2, 1024>}]} {
    %c0 = arith.constant 0 : index
    %c0_0 = arith.constant 0 : index
    %0 = vector.load %arg1[%c0, %c0_0] : memref<2x1024xf32, #tpu.memory_space<vmem>>, vector<2x1024xf32>
    %cst = arith.constant 0.000000e+00 : f32
    %1 = vector.broadcast %cst : f32 to vector<2x1024xf32>
    %2 = arith.cmpf ogt, %0, %1 : vector<2x1024xf32>
    %cst_1 = arith.constant 0.00999999977 : f32
    %3 = vector.broadcast %cst_1 : f32 to vector<2x1024xf32>
    %4 = arith.mulf %0, %3 : vector<2x1024xf32>
    %5 = arith.select %2, %0, %4 : vector<2x1024xi1>, vector<2x1024xf32>
    %c0_2 = arith.constant 0 : index
    %c0_3 = arith.constant 0 : index
    %6 = vector.load %arg2[%c0_2, %c0_3] : memref<2x1024xf32, #tpu.memory_space<vmem>>, vector<2x1024xf32>
    tpu.vector_store %arg2[%c0_2, %c0_3], %5 {strides = array<i32>} : memref<2x1024xf32, #tpu.memory_space<vmem>>, vector<2x1024xf32>,
    return
  }
  func.func @transform_0(%arg0: i32) -> (i32, i32) {
    %c0_i32 = arith.constant 0 : i32
    %c0_i32_0 = arith.constant 0 : i32
    return %arg0, %c0_i32 : i32, i32
  }
  func.func @transform_1(%arg0: i32) -> (i32, i32) {
    %c0_i32 = arith.constant 0 : i32
    %c0_i32_0 = arith.constant 0 : i32
    return %arg0, %c0_i32 : i32, i32
  }
}

</mosaic_0001>

<bundles_post_ra>
// kernel: tpu_custom_call.1
= control target key start
LH: loop header
LB: loop body
LE: loop exit
PB: predicated region body
PF: predicated region fallthrough
CT: control target
= control target key end

     0   :  { %6 = vsyncpa [#allocation3], 0  ;;  %s132_s0 = inlined_call_operand.hbm [shape: f32[2,1024], index: 0, kind: input, shape index: {}]   ;;  %s133_s1 = inlined_call_operand.hbm [shape: f32[2,1024], index: 1, kind: output, shape index: {}]  }
   0x1   :  { %7 = vsyncpa [#allocation4], 0  ;;  %s96_s6 = smov [#allocation2]   ;;  %s48_s10 = scalar_lea.hbm %s132_s0, 256 }
   0x2   :  { %s14_s7 = sshll.u32 %s96_s6, 4  ;;  %p49_p0 = scmp.ne.s32.totalorder %s132_s0, %s48_s10  ;;  %s15_s7 = int_to_ptr.vmem [resolvable:$true] %s14_s7 }
   0x3   :  { %p52_p1 = scmp.lt.u32.totalorder %s48_s10, %s132_s0 }
   0x5   :  { %p54_p2 = pnand %p52_p1, %p49_p0 }
   0x7   :  { %57 = shalt.err (!%p54_p2)
}
   0x8   :  { %s58_s15 = scalar_lea.vmem %s15_s7, 256  ;;  %p63_p4 = scmp.lt.s32.totalorder %s15_s7, %s15_s7 }
   0x9   :  { %p59_p3 = scmp.ne.s32.totalorder %s15_s7, %s58_s15  ;;  %p64_p5 = scmp.lt.s32.totalorder %s58_s15, %s58_s15 }
   0xb   :  { %p65_p6 = por %p64_p5, %p63_p4 }
   0xd   :  { %p66_p7 = pnand %p65_p6, %p59_p3 }
   0xf   :  { %69 = shalt.err (!%p66_p7)
}
  0x10   :  { %17 = dma.hbm_to_vmem [thread:$0]  %s132_s0, 256, %s15_s7, [#allocation3]  }
  0x11   :  { %92 = dma.done.wait [#allocation3], 256  }
  0x12   :  { %93 = vsyncadd [#allocation3], 4294967040  ;;  %s97_s18 = smov [#allocation5]   ;;  %v21_v0 = vld [vmem:[#allocation2] sm:$0xff]  ;;  %v22_v1 = vld [vmem:[#allocation2 + $0x8] sm:$0xff] }
  0x13   :  { %s37_s19 = sshll.u32 %s97_s18, 4  ;;  %vm23_vm0 = vcmp.gt.f32.partialorder %v21_v0, 0.0  ;;  %v25_v2 = vmul.f32 0.01, %v21_v0  ;;  %vm24_vm1 = vcmp.gt.f32.partialorder %v22_v1, 0.0  ;;  %s38_s19 = int_to_ptr.vmem [resolvable:$true] %s37_s19 }
  0x14   :  { %v26_v3 = vmul.f32 0.01, %v22_v1  ;;  %s70_s20 = scalar_lea.vmem %s38_s19, 256  ;;  %p75_p9 = scmp.lt.s32.totalorder %s38_s19, %s38_s19 }
  0x15   :  { %v27_v4 = vsel %vm23_vm0, %v21_v0, %v25_v2  ;;  %p71_p8 = scmp.ne.s32.totalorder %s38_s19, %s70_s20  ;;  %p76_p10 = scmp.lt.s32.totalorder %s70_s20, %s70_s20 }
  0x16   :  { %v28_v5 = vsel %vm24_vm1, %v22_v1, %v26_v3  ;;  %29 = vst [vmem:[#allocation5] sm:$0xff] %v27_v4 }
  0x17   :  { %30 = vst [vmem:[#allocation5 + $0x8] sm:$0xff] %v28_v5  ;;  %p77_p11 = por %p76_p10, %p75_p9 }
  0x19   :  { %p78_p12 = pnand %p77_p11, %p71_p8 }
  0x1b   :  { %81 = shalt.err (!%p78_p12)
}
  0x1c   :  { %s82_s22 = scalar_lea.hbm %s133_s1, 256 }
  0x1d   :  { %p83_p13 = scmp.ne.s32.totalorder %s133_s1, %s82_s22  ;;  %p86_p0 = scmp.lt.u32.totalorder %s82_s22, %s133_s1 }
  0x1f   :  { %p88_p1 = pnand %p86_p0, %p83_p13 }
  0x21   :  { %91 = shalt.err (!%p88_p1)
}
  0x22   :  { %40 = dma.vmem_to_hbm [thread:$0]  %s38_s19, 256, %s133_s1, [#allocation4]  }
  0x23   :  { %94 = dma.done.wait [#allocation4], 256  }
  0x24   :  { %95 = vsyncadd [#allocation4], 4294967040 }
  0x25   :  { %44 = vsyncpa [#allocation3], 1 }
  0x26   :  { %45 = vsyncpa [#allocation4], 1 }

</bundles_post_ra>
